<compile_context>
chip_gen: v7x
topology: tpu7x:2x2x1
jax: 0.10.0
libtpu: 0.0.40
codegen_flags: <defaults>
</compile_context>

<pallas_src>
import functools

import jax
import jax.numpy as jnp
from jax.experimental import pallas as pl
from jax.experimental.pallas import tpu as pltpu


def _embedding_kernel(xi_ref, xj_ref, w1_ref, wmu_ref, bias_ref,
                      scal_ref, mu_ref, *, dot_dtype):
    Bt, T, S = xi_ref.shape
    E = mu_ref.shape[-1]
    I = w1_ref.shape[-1]          # intermediate_dimension (32)
    R = Bt * 2 * T

    # Fuse [traj_i | traj_j] along the timestep (sublane) axis, then merge the
    # batch dim into the row dim so both matmuls see one (Bt*2T, S) operand.
    # 2T is a multiple of 8 -> concat + reshape are layout no-ops.
    x = jnp.concatenate([xi_ref[...], xj_ref[...]], axis=1).reshape(R, S)
    x = jax.nn.sigmoid(x.astype(jnp.float32))             # torch.sigmoid

    b1 = bias_ref[:, :I]          # (1, I)
    bmu_aug = bias_ref[:, I:]     # (1, E+1)

    # fc1 + leaky_relu (negative_slope = 0.01, PyTorch default)
    h = jnp.dot(x.astype(dot_dtype), w1_ref[...].astype(dot_dtype),
                preferred_element_type=jnp.float32) + b1
    h = jnp.where(h > 0, h, 0.01 * h)

    # fc_mu with fc2 folded in: wmu_ref = [wmu | wmu@w2], bmu_aug[E] = bmu@w2+b2
    # => mu_aug[:, :E] == mu  and  mu_aug[:, E] == r (per-step reward), exactly.
    mu_aug = jnp.dot(h.astype(dot_dtype), wmu_ref[...].astype(dot_dtype),
                     preferred_element_type=jnp.float32) + bmu_aug

    mu = mu_aug[:, :E]                                      # (R, E)
    r3 = mu_aug[:, E:].reshape(Bt, 2 * T, 1)                # leading-dim split

    r_i = r3[:, :T, :]            # aligned sublane slices (T multiple of 8)
    r_j = r3[:, T:, :]

    # Single merged scalar output: [sum_r_i, sum_r_j, sum|r|_i, sum|r|_j]
    scal_ref[...] = jnp.concatenate(
        [jnp.sum(r_i, axis=1), jnp.sum(r_j, axis=1),
         jnp.sum(jnp.abs(r_i), axis=1), jnp.sum(jnp.abs(r_j), axis=1)],
        axis=1)

    # mu for both trajectories, per batch element: (Bt, 2T, E).
    mu_ref[...] = mu.reshape(Bt, 2 * T, E).astype(mu_ref.dtype)


def fuse_params(params):
    """One-time (init/checkpoint-load-time) parameter prep.

    Folds fc2 into fc_mu and packs the biases into a single row.
      in : (w1[S,I], b1[1,I], wmu[I,E], bmu[1,E], w2[E,1], b2[1,1])
      out: (w1[S,I], wmu_aug[I,E+1], bias_row[1, I+E+1])
    """
    w1, b1, wmu, bmu, w2, b2 = params
    wmu_aug = jnp.concatenate([wmu, wmu @ w2], axis=1)
    bmu_aug = jnp.concatenate([bmu, bmu @ w2 + b2], axis=1)
    bias_row = jnp.concatenate([b1, bmu_aug], axis=1)
    return w1, wmu_aug, bias_row


def embedding_net_forward_batched(traj_i, traj_j, fused_params, *,
                                  dot_dtype=jnp.float32, max_batch_tile=128):
    """EmbeddingNet.forward over a batch of trajectory pairs.

    traj_i, traj_j: (B, T, S).
    Returns (logits[B, 2], sum_abs_rewards[B], mu1[B, T, E], mu2[B, T, E]).
    """
    w1, wmu_aug, bias_row = fused_params
    B, T, S = traj_i.shape
    I = w1.shape[1]
    E = wmu_aug.shape[1] - 1

    # TODO(synk): T is assumed to be a multiple of 8 so the in-kernel i/j split
    # stays sublane-aligned; pad T in the caller otherwise.

    if B <= max_batch_tile:
        b_tile, b_pad = B, B
    else:
        b_tile = max_batch_tile                     # multiple of 8
        b_pad = pl.cdiv(B, b_tile) * b_tile
        pad = ((0, b_pad - B), (0, 0), (0, 0))
        traj_i = jnp.pad(traj_i, pad)
        traj_j = jnp.pad(traj_j, pad)

    kernel = functools.partial(_embedding_kernel, dot_dtype=dot_dtype)

    scal, mus = pl.pallas_call(
        kernel,
        out_shape=(
            jax.ShapeDtypeStruct((b_pad, 4), jnp.float32),            # merged scalars
            jax.ShapeDtypeStruct((b_pad, 2 * T, E), jnp.float32),     # mu (i then j)
        ),
        grid_spec=pltpu.PrefetchScalarGridSpec(
            num_scalar_prefetch=0,
            grid=(b_pad // b_tile,),
            in_specs=[
                pl.BlockSpec((b_tile, T, S), lambda b: (b, 0, 0)),
                pl.BlockSpec((b_tile, T, S), lambda b: (b, 0, 0)),
                pl.BlockSpec((S, I), lambda b: (0, 0)),
                pl.BlockSpec((I, E + 1), lambda b: (0, 0)),
                pl.BlockSpec((1, I + E + 1), lambda b: (0, 0)),
            ],
            out_specs=(
                pl.BlockSpec((b_tile, 4), lambda b: (b, 0)),
                pl.BlockSpec((b_tile, 2 * T, E), lambda b: (b, 0, 0)),
            ),
        ),
        compiler_params=pltpu.CompilerParams(
            dimension_semantics=("parallel",),     # 2 TCs on v7x; no-op on v5e/v6e
            vmem_limit_bytes=32 * 1024 * 1024,     # explicit headroom vs v7x 64 MiB
        ),
    )(traj_i, traj_j, w1, wmu_aug, bias_row)

    scal, mus = scal[:B], mus[:B]
    logits = scal[:, 0:2]                          # [cum_r_i, cum_r_j]
    sum_abs = scal[:, 2] + scal[:, 3]              # abs_r_i + abs_r_j
    mu1, mu2 = mus[:, :T, :], mus[:, T:, :]
    return logits, sum_abs, mu1, mu2


def embedding_net_forward(traj_i, traj_j, fused_params, *, dot_dtype=jnp.float32):
    """Single-pair EmbeddingNet.forward (mirrors the PyTorch module API)."""
    logits, sum_abs, mu1, mu2 = embedding_net_forward_batched(
        traj_i[None], traj_j[None], fused_params, dot_dtype=dot_dtype)
    # TODO(synk): in the PyTorch source, cum_return() returns only sum_rewards,
    # so forward()'s 3-way unpack would raise; we return the clearly intended
    # quantities (logits, abs_r_i + abs_r_j, mu1, mu2).
    return logits[0], sum_abs[0], mu1[0], mu2[0]


def init_params(key, state_dims, encoding_dims, intermediate=32):
    """Deterministic parameter init (synthetic, not a checkpoint)."""
    k1, k2, k3, k4, k5, k6 = jax.random.split(key, 6)
    w1 = jax.random.normal(k1, (state_dims, intermediate), jnp.float32) * 0.1
    b1 = jax.random.normal(k2, (1, intermediate), jnp.float32) * 0.1
    wmu = jax.random.normal(k3, (intermediate, encoding_dims), jnp.float32) * 0.1
    bmu = jax.random.normal(k4, (1, encoding_dims), jnp.float32) * 0.1
    w2 = jax.random.normal(k5, (encoding_dims, 1), jnp.float32) * 0.1
    b2 = jax.random.normal(k6, (1, 1), jnp.float32) * 0.1
    return (w1, b1, wmu, bmu, w2, b2)


def _reference(traj, params):
    """Pure-JAX reference of cum_return / get_rewards for sanity check."""
    w1, b1, wmu, bmu, w2, b2 = params
    x = jax.nn.sigmoid(traj)
    h = x @ w1 + b1
    h = jnp.where(h > 0, h, 0.01 * h)
    mu = h @ wmu + bmu
    r = mu @ w2 + b2
    return jnp.sum(r), jnp.sum(jnp.abs(r)), mu


if __name__ == "__main__":
    STATE_DIMS = 16
    ENCODING_DIMS = 8
    T = 8       # trajectory length (multiple of 8)
    B = 8       # batched trajectory pairs

    key = jax.random.PRNGKey(0)
    kp, ki, kj, kbi, kbj = jax.random.split(key, 5)
    raw_params = init_params(kp, STATE_DIMS, ENCODING_DIMS)
    fused = fuse_params(raw_params)

    # --- single pair (PyTorch module API) ---
    traj_i = jax.random.normal(ki, (T, STATE_DIMS), jnp.float32)
    traj_j = jax.random.normal(kj, (T, STATE_DIMS), jnp.float32)
    logits, abs_total, mu1, mu2 = embedding_net_forward(traj_i, traj_j, fused)

    # --- batched pairs (throughput path) ---
    bi = jax.random.normal(kbi, (B, T, STATE_DIMS), jnp.float32)
    bj = jax.random.normal(kbj, (B, T, STATE_DIMS), jnp.float32)
    blogits, babs, bmu1, bmu2 = embedding_net_forward_batched(bi, bj, fused)

    jax.block_until_ready((logits, abs_total, mu1, mu2, blogits, babs, bmu1, bmu2))

    # sanity-check against pure-JAX reference
    ri, ai, m1 = _reference(traj_i, raw_params)
    rj, aj, m2 = _reference(traj_j, raw_params)
    assert jnp.allclose(logits, jnp.stack([ri, rj]), atol=1e-4), "logits mismatch"
    assert jnp.allclose(abs_total, ai + aj, atol=1e-4), "abs sum mismatch"
    assert jnp.allclose(mu1, m1, atol=1e-4), "mu1 mismatch"
    assert jnp.allclose(mu2, m2, atol=1e-4), "mu2 mismatch"

    for b in range(B):
        ri, ai, m1 = _reference(bi[b], raw_params)
        rj, aj, m2 = _reference(bj[b], raw_params)
        assert jnp.allclose(blogits[b], jnp.stack([ri, rj]), atol=1e-4), "batched logits mismatch"
        assert jnp.allclose(babs[b], ai + aj, atol=1e-4), "batched abs mismatch"
        assert jnp.allclose(bmu1[b], m1, atol=1e-4), "batched mu1 mismatch"
        assert jnp.allclose(bmu2[b], m2, atol=1e-4), "batched mu2 mismatch"

    print("KERNEL_OK")
</pallas_src>

<mosaic_0001>
module attributes {stable_mosaic.version = 11 : i64} {
  func.func @_embedding_kernel(%arg0: i32, %arg1: memref<1x8x16xf32, #tpu.memory_space<vmem>>, %arg2: memref<1x8x16xf32, #tpu.memory_space<vmem>>, %arg3: memref<16x32xf32, #tpu.memory_space<vmem>>, %arg4: memref<32x9xf32, #tpu.memory_space<vmem>>, %arg5: memref<1x41xf32, #tpu.memory_space<vmem>>, %arg6: memref<1x4xf32, #tpu.memory_space<vmem>>, %arg7: memref<1x16x8xf32, #tpu.memory_space<vmem>>) attributes {dimension_semantics = [#tpu.dimension_semantics<parallel>], iteration_bounds = array<i64: 1>, scalar_prefetch = 0 : i64, scratch_operands = 0 : i64, tpu.core_type = #tpu.core_type<tc>, window_params = [{transform_indices = @transform_0, window_bounds = array<i64: 1, 8, 16>}, {transform_indices = @transform_1, window_bounds = array<i64: 1, 8, 16>}, {pipeline_mode = #tpu.pipeline_mode<synchronous>, transform_indices = @transform_2, window_bounds = array<i64: 16, 32>}, {pipeline_mode = #tpu.pipeline_mode<synchronous>, transform_indices = @transform_3, window_bounds = array<i64: 32, 9>}, {pipeline_mode = #tpu.pipeline_mode<synchronous>, transform_indices = @transform_4, window_bounds = array<i64: 1, 41>}, {transform_indices = @transform_5, window_bounds = array<i64: 1, 4>}, {transform_indices = @transform_6, window_bounds = array<i64: 1, 16, 8>}]} {
    %c0 = arith.constant 0 : index
    %c0_0 = arith.constant 0 : index
    %c0_1 = arith.constant 0 : index
    %0 = vector.load %arg1[%c0, %c0_0, %c0_1] : memref<1x8x16xf32, #tpu.memory_space<vmem>>, vector<1x8x16xf32>
    %c0_2 = arith.constant 0 : index
    %c0_3 = arith.constant 0 : index
    %c0_4 = arith.constant 0 : index
    %1 = vector.load %arg2[%c0_2, %c0_3, %c0_4] : memref<1x8x16xf32, #tpu.memory_space<vmem>>, vector<1x8x16xf32>
    %2 = tpu.concatenate %0, %1 in 1 : vector<1x8x16xf32>, vector<1x8x16xf32> -> vector<1x16x16xf32>
    %3 = vector.shape_cast %2 : vector<1x16x16xf32> to vector<16x16xf32>
    %4 = arith.negf %3 : vector<16x16xf32>
    %5 = math.exp %4 : vector<16x16xf32>
    %cst = arith.constant 1.000000e+00 : f32
    %6 = vector.broadcast %cst : f32 to vector<16x16xf32>
    %7 = arith.addf %6, %5 : vector<16x16xf32>
    %8 = arith.divf %6, %7 : vector<16x16xf32>
    %c0_5 = arith.constant 0 : index
    %c0_6 = arith.constant 0 : index
    %9 = vector.load %arg5[%c0_5, %c0_6] : memref<1x41xf32, #tpu.memory_space<vmem>>, vector<1x32xf32>
    %c0_7 = arith.constant 0 : index
    %c32 = arith.constant 32 : index
    %10 = vector.load %arg5[%c0_7, %c32] : memref<1x41xf32, #tpu.memory_space<vmem>>, vector<1x9xf32>
    %c0_8 = arith.constant 0 : index
    %c0_9 = arith.constant 0 : index
    %11 = vector.load %arg3[%c0_8, %c0_9] : memref<16x32xf32, #tpu.memory_space<vmem>>, vector<16x32xf32>
    %cst_10 = arith.constant dense<0.000000e+00> : vector<16x32xf32>
    %12 = tpu.matmul %8, %11, %cst_10 {dimension_numbers = #tpu.dot_dimension_numbers<[1], [0], [0], [1], [0, 0, 1, 1], [], []>} : vector<16x16xf32>, vector<16x32xf32>, vector<16x32xf32> -> vector<16x32xf32>
    %13 = vector.broadcast %9 : vector<1x32xf32> to vector<16x32xf32>
    %14 = arith.addf %12, %13 : vector<16x32xf32>
    %cst_11 = arith.constant 0.000000e+00 : f32
    %15 = vector.broadcast %cst_11 : f32 to vector<16x32xf32>
    %16 = arith.cmpf ogt, %14, %15 : vector<16x32xf32>
    %cst_12 = arith.constant 0.00999999977 : f32
    %17 = vector.broadcast %cst_12 : f32 to vector<16x32xf32>
    %18 = arith.mulf %17, %14 : vector<16x32xf32>
    %19 = arith.select %16, %14, %18 : vector<16x32xi1>, vector<16x32xf32>
    %c0_13 = arith.constant 0 : index
    %c0_14 = arith.constant 0 : index
    %20 = vector.load %arg4[%c0_13, %c0_14] : memref<32x9xf32, #tpu.memory_space<vmem>>, vector<32x9xf32>
    %cst_15 = arith.constant dense<0.000000e+00> : vector<16x9xf32>
    %21 = tpu.matmul %19, %20, %cst_15 {dimension_numbers = #tpu.dot_dimension_numbers<[1], [0], [0], [1], [0, 0, 1, 1], [], []>} : vector<16x32xf32>, vector<32x9xf32>, vector<16x9xf32> -> vector<16x9xf32>
    %22 = vector.broadcast %10 : vector<1x9xf32> to vector<16x9xf32>
    %23 = arith.addf %21, %22 : vector<16x9xf32>
    %24 = vector.extract_strided_slice %23 {offsets = [0, 0], sizes = [16, 8], strides = [1, 1]} : vector<16x9xf32> to vector<16x8xf32>
    %25 = vector.extract_strided_slice %23 {offsets = [0, 8], sizes = [16, 1], strides = [1, 1]} : vector<16x9xf32> to vector<16x1xf32>
    %26 = vector.shape_cast %25 : vector<16x1xf32> to vector<1x16x1xf32>
    %27 = vector.extract_strided_slice %26 {offsets = [0, 0, 0], sizes = [1, 8, 1], strides = [1, 1, 1]} : vector<1x16x1xf32> to vector<1x8x1xf32>
    %28 = vector.extract_strided_slice %26 {offsets = [0, 8, 0], sizes = [1, 8, 1], strides = [1, 1, 1]} : vector<1x16x1xf32> to vector<1x8x1xf32>
    %cst_16 = arith.constant dense<0.000000e+00> : vector<1x1xf32>
    %29 = vector.multi_reduction <add>, %27, %cst_16 [1] : vector<1x8x1xf32> to vector<1x1xf32>
    %cst_17 = arith.constant dense<0.000000e+00> : vector<1x1xf32>
    %30 = vector.multi_reduction <add>, %28, %cst_17 [1] : vector<1x8x1xf32> to vector<1x1xf32>
    %31 = math.absf %27 : vector<1x8x1xf32>
    %cst_18 = arith.constant dense<0.000000e+00> : vector<1x1xf32>
    %32 = vector.multi_reduction <add>, %31, %cst_18 [1] : vector<1x8x1xf32> to vector<1x1xf32>
    %33 = math.absf %28 : vector<1x8x1xf32>
    %cst_19 = arith.constant dense<0.000000e+00> : vector<1x1xf32>
    %34 = vector.multi_reduction <add>, %33, %cst_19 [1] : vector<1x8x1xf32> to vector<1x1xf32>
    %35 = tpu.concatenate %29, %30, %32, %34 in 1 : vector<1x1xf32>, vector<1x1xf32>, vector<1x1xf32>, vector<1x1xf32> -> vector<1x4xf32>
    %c0_20 = arith.constant 0 : index
    %c0_21 = arith.constant 0 : index
    %36 = vector.load %arg6[%c0_20, %c0_21] : memref<1x4xf32, #tpu.memory_space<vmem>>, vector<1x4xf32>
    tpu.vector_store %arg6[%c0_20, %c0_21], %35 {strides = array<i32>} : memref<1x4xf32, #tpu.memory_space<vmem>>, vector<1x4xf32>,
    %37 = vector.shape_cast %24 : vector<16x8xf32> to vector<1x16x8xf32>
    %c0_22 = arith.constant 0 : index
    %c0_23 = arith.constant 0 : index
    %c0_24 = arith.constant 0 : index
    %38 = vector.load %arg7[%c0_22, %c0_23, %c0_24] : memref<1x16x8xf32, #tpu.memory_space<vmem>>, vector<1x16x8xf32>
    tpu.vector_store %arg7[%c0_22, %c0_23, %c0_24], %37 {strides = array<i32>} : memref<1x16x8xf32, #tpu.memory_space<vmem>>, vector<1x16x8xf32>,
    return
  }
  func.func @transform_0(%arg0: i32) -> (i32, i32, i32) {
    %c0_i32 = arith.constant 0 : i32
    %c0_i32_0 = arith.constant 0 : i32
    %c0_i32_1 = arith.constant 0 : i32
    return %arg0, %c0_i32, %c0_i32_0 : i32, i32, i32
  }
  func.func @transform_1(%arg0: i32) -> (i32, i32, i32) {
    %c0_i32 = arith.constant 0 : i32
    %c0_i32_0 = arith.constant 0 : i32
    %c0_i32_1 = arith.constant 0 : i32
    return %arg0, %c0_i32, %c0_i32_0 : i32, i32, i32
  }
  func.func @transform_2(%arg0: i32) -> (i32, i32) {
    %c0_i32 = arith.constant 0 : i32
    %c0_i32_0 = arith.constant 0 : i32
    %c0_i32_1 = arith.constant 0 : i32
    return %c0_i32, %c0_i32_0 : i32, i32
  }
  func.func @transform_3(%arg0: i32) -> (i32, i32) {
    %c0_i32 = arith.constant 0 : i32
    %c0_i32_0 = arith.constant 0 : i32
    %c0_i32_1 = arith.constant 0 : i32
    return %c0_i32, %c0_i32_0 : i32, i32
  }
  func.func @transform_4(%arg0: i32) -> (i32, i32) {
    %c0_i32 = arith.constant 0 : i32
    %c0_i32_0 = arith.constant 0 : i32
    %c0_i32_1 = arith.constant 0 : i32
    return %c0_i32, %c0_i32_0 : i32, i32
  }
  func.func @transform_5(%arg0: i32) -> (i32, i32) {
    %c0_i32 = arith.constant 0 : i32
    %c0_i32_0 = arith.constant 0 : i32
    return %arg0, %c0_i32 : i32, i32
  }
  func.func @transform_6(%arg0: i32) -> (i32, i32, i32) {
    %c0_i32 = arith.constant 0 : i32
    %c0_i32_0 = arith.constant 0 : i32
    %c0_i32_1 = arith.constant 0 : i32
    return %arg0, %c0_i32, %c0_i32_0 : i32, i32, i32
  }
}

</mosaic_0001>

<bundles_post_ra>
// kernel: tpu_custom_call.1
= control target key start
LH: loop header
LB: loop body
LE: loop exit
PB: predicated region body
PF: predicated region fallthrough
CT: control target
= control target key end

     0   :  { %s470_s0 = inlined_call_operand.vmem [shape: f32[1,8,16], index: 0, kind: input, shape index: {}]   ;;  %s471_s1 = inlined_call_operand.vmem [shape: f32[1,8,16], index: 1, kind: input, shape index: {}]   ;;  %s472_s2 = inlined_call_operand.vmem [shape: f32[16,32], index: 2, kind: input, shape index: {}]   ;;  %s473_s3 = inlined_call_operand.vmem [shape: f32[32,9], index: 3, kind: input, shape index: {}]   ;;  %s474_s4 = inlined_call_operand.vmem [shape: f32[1,41], index: 4, kind: input, shape index: {}]   ;;  %s475_s5 = inlined_call_operand.hbm [shape: f32[1,4], index: 5, kind: output, shape index: {0}]   ;;  %s476_s6 = inlined_call_operand.vmem [shape: f32[1,16,8], index: 6, kind: output, shape index: {1}]  }
   0x1   :  { %v38_v0 = vld [vmem:[%s472_s2] sm:$0xff]  ;;  %v39_v1 = vld [vmem:[%s472_s2 + $0x8] sm:$0xff] }
   0x2   :  { %v23_v2 = vld [vmem:[%s470_s0] sm:$0xff]  ;;  %v334_v3 = vpack.c.bf16 %v39_v1, %v38_v0 }
   0x3   :  { %v299_v4 = vmul.f32 -1.442695, %v23_v2  ;;  %v24_v5 = vld [vmem:[%s471_s1] sm:$0xff] }
   0x4   :  { %12 = vsyncpa [#allocation3], 0  ;;  %v300_v6 = vmul.f32 -1.442695, %v24_v5  ;;  %335 = vmatprep.subr.bf16.mxu0 %v334_v3  ;;  %vm46_vm0 = vcmask 130048   ;;  %v134_v13 = vld [vmem:[%s473_s3] sm:$0xff] }
   0x5   :  { %352 = vpow2.f32 %v299_v4  ;;  %337 = vmatpush3.bf16.msra.mxu0 %v334_v3  ;;  %v135_v14 = vld [vmem:[%s473_s3 + $0x8] sm:$0xff]  ;;  %v136_v16 = vld [vmem:[%s473_s3 + $0x10] sm:$0xff]  ;;  %v137_v17 = vld [vmem:[%s473_s3 + $0x18] sm:$0xff]  ;;  %s384_s12 = smov 96   ;;  %vm141_vm3 = vcmask 261120   ;;  %vm223_vm4 = vcmask 72768  }
   0x6   :  { %354 = vpow2.f32 %v300_v6  ;;  %v338_v15 = vpack.c.bf16 %v135_v14, %v134_v13  ;;  %v342_v18 = vpack.c.bf16 %v137_v17, %v136_v16  ;;  %v301_v19 = vld [vmem:[%s474_s4] ss:$0 sm:$0xff]  ;;  %vm278_vm5 = vcmask 64512   ;;  %s386_s15 = smov 120   ;;  %s387_s16 = smov 122  }
   0x7   :  { %138 = vrot.lane.b32.xlu0 %v301_v19, %s384_s12  ;;  %s388_s17 = smov 123   ;;  %vm270_vm6 = vcmask 7168   ;;  %vm272_vm7 = vcmask 15360   ;;  %s389_s18 = smov [#allocation2]   ;;  %vm274_vm8 = vcmask 23552   ;;  %vm276_vm9 = vcmask 24576  }
   0x8   :  { %339 = vmatprep.subr.bf16.mxu1 %v338_v15  ;;  %s287_s19 = sshll.u32 %s389_s18, 4  ;;  %s288_s19 = int_to_ptr.vmem [resolvable:$true] %s287_s19 }
   0x9   :  { %341 = vmatpush3.bf16.msra.mxu1 %v338_v15  ;;  %s360_s20 = scalar_lea.vmem %s288_s19, 16  ;;  %s364_s21 = scalar_lea.vmem %s288_s19, 32 }
   0xa   :  { %343 = vmatprep.subr.bf16.mxu1 %v342_v18  ;;  %p361_p0 = scmp.ne.s32.totalorder %s288_s19, %s360_s20  ;;  %p365_p1 = scmp.lt.s32.totalorder %s288_s19, %s288_s19 }
   0xb   :  { %p366_p2 = scmp.lt.s32.totalorder %s364_s21, %s360_s20 }
   0xd   :  { %345 = vmatpush3.bf16.msra.mxu1 %v342_v18  ;;  %p367_p3 = por %p366_p2, %p365_p1 }
   0xf   :  { %v353_v7 = vpop.eup %352  ;;  %p368_p4 = pnand %p367_p3, %p361_p0 }
  0x10   :  { %v355_v8 = vpop.eup %354  ;;  %v31_v9 = vadd.f32 1.0, %v353_v7 }
  0x11   :  { %v32_v10 = vadd.f32 1.0, %v355_v8 }
  0x12   :  { %356 = vrcp.f32 %v31_v9 }
  0x13   :  { %358 = vrcp.f32 %v32_v10 }
  0x1c   :  { %v357_v11 = vpop.eup %356 }
  0x1d   :  { %v359_v12 = vpop.eup %358  ;;  %320 = vmatprep.mubr.msk.f32.mxu0 %vm46_vm0, %v357_v11 }
  0x1e   :  { %321 = vmatmul.mubr.msk.f32.vlgmr.msra.gmra.mrb[0].mxu0 %vm46_vm0, %v359_v12 }
  0x79   :  { %v139_v28 = vpop.permute.xlu0 %138 }
  0xf1   :  { %v322_v20 = vpop.f32.mrb[0].mxu0 }
  0xf2   :  { %v125_v21 = vadd.f32 %v322_v20, %v301_v19  ;;  %v119_v22 = vpop.f32.mrb[1].mxu0 }
  0xf3   :  { %v120_v23 = vadd.f32 %v301_v19, %v119_v22 }
  0xf4   :  { %v131_v24 = vmul.f32 0.01, %v125_v21  ;;  %vm129_vm1 = vcmp.gt.f32.partialorder %v125_v21, 0.0 }
  0xf5   :  { %vm128_vm2 = vcmp.gt.f32.partialorder %v120_v23, 0.0  ;;  %v130_v25 = vmul.f32 0.01, %v120_v23 }
  0xf6   :  { %v133_v27 = vsel %vm129_vm1, %v125_v21, %v131_v24 }
  0xf7   :  { %v132_v26 = vsel %vm128_vm2, %v120_v23, %v130_v25 }
  0xf8   :  { %331 = vmatprep.mubr.msk.f32.mxu1 %vm141_vm3, %v132_v26 }
  0xf9   :  { %332 = vmatmul.mubr.msk.f32.vlgmr.msra.gmra.mrb[0].mxu1 %vm141_vm3, %v133_v27 }
 0x1cc   :  { %v333_v29 = vpop.f32.mrb[0].mxu1 }
 0x1cd   :  { %v220_v30 = vadd.f32 %v333_v29, %v139_v28  ;;  %v214_v31 = vpop.f32.mrb[1].mxu1 }
 0x1ce   :  { %v215_v32 = vadd.f32 %v214_v31, %v139_v28 }
 0x1cf   :  { %v231_v33 = vsel %vm223_vm4, %v220_v30, 0.0  ;;  %v246_v34 = vand.u32 2147483647, %v220_v30  ;;  %280 = vst.msk [vmem:[%s476_s6 + $0x8] sm:$0xff] %vm278_vm5, %v220_v30 }
 0x1d0   :  { %v232_v35 = vrot.slane %v231_v33, 4  ;;  %v224_v36 = vsel %vm223_vm4, %v215_v32, 0.0  ;;  %v238_v37 = vand.u32 2147483647, %v215_v32  ;;  %279 = vst.msk [vmem:[%s476_s6] sm:$0xff] %vm278_vm5, %v215_v32  ;;  %s385_s6 = smov 121  }
 0x1d1   :  { %v247_v38 = vsel %vm223_vm4, %v246_v34, 0.0  ;;  %v225_v39 = vrot.slane %v224_v36, 4 }
 0x1d2   :  { %v248_v40 = vrot.slane %v247_v38, 4  ;;  %v239_v41 = vsel %vm223_vm4, %v238_v37, 0.0  ;;  %v233_v42 = vadd.f32 %v232_v35, %v231_v33 }
 0x1d3   :  { %v226_v43 = vadd.f32 %v225_v39, %v224_v36  ;;  %v240_v44 = vrot.slane %v239_v41, 4 }
 0x1d4   :  { %v234_v45 = vrot.slane %v233_v42, 2  ;;  %v249_v46 = vadd.f32 %v248_v40, %v247_v38 }
 0x1d5   :  { %v227_v47 = vrot.slane %v226_v43, 2  ;;  %v241_v48 = vadd.f32 %v240_v44, %v239_v41 }
 0x1d6   :  { %v235_v49 = vadd.f32 %v234_v45, %v233_v42  ;;  %v250_v50 = vrot.slane %v249_v46, 2 }
 0x1d7   :  { %v228_v51 = vadd.f32 %v227_v47, %v226_v43  ;;  %v242_v52 = vrot.slane %v241_v48, 2 }
 0x1d8   :  { %v236_v53 = vrot.slane %v235_v49, 1  ;;  %v251_v54 = vadd.f32 %v250_v50, %v249_v46 }
 0x1d9   :  { %v229_v55 = vrot.slane %v228_v51, 1  ;;  %v243_v56 = vadd.f32 %v242_v52, %v241_v48 }
 0x1da   :  { %v237_v57 = vadd.f32 %v236_v53, %v235_v49  ;;  %v252_v60 = vrot.slane %v251_v54, 1 }
 0x1db   :  { %v230_v58 = vadd.f32 %v229_v55, %v228_v51  ;;  %v244_v59 = vrot.slane %v243_v56, 1 }
 0x1dc   :  { %259 = vrot.lane.b32.xlu1 %v237_v57, %s385_s6  ;;  %v253_v62 = vadd.f32 %v252_v60, %v251_v54 }
 0x1dd   :  { %255 = vrot.lane.b32.xlu0 %v230_v58, %s386_s15  ;;  %v245_v61 = vadd.f32 %v244_v59, %v243_v56 }
 0x1e0   :  { %263 = vrot.lane.b32.xlu1 %v245_v61, %s387_s16 }
 0x1e1   :  { %267 = vrot.lane.b32.xlu0 %v253_v62, %s388_s17 }
 0x24e   :  { %v260_v63 = vpop.permute.xlu1 %259 }
 0x24f   :  { %v256_v0 = vpop.permute.xlu0 %255 }
 0x250   :  { %v271_v1 = vsel %vm270_vm6, %v256_v0, %v260_v63 }
 0x252   :  { %v264_v2 = vpop.permute.xlu1 %263 }
 0x253   :  { %v273_v3 = vsel %vm272_vm7, %v271_v1, %v264_v2  ;;  %v268_v4 = vpop.permute.xlu0 %267 }
 0x254   :  { %v275_v5 = vsel %vm274_vm8, %v273_v3, %v268_v4 }
 0x255   :  { %277 = vst.msk [vmem:[#allocation2] sm:$0x1] %vm276_vm9, %v275_v5 }
 0x256   :  { %371 = shalt.err (!%p368_p4)
}
 0x257   :  { %s372_s24 = scalar_lea.hbm %s475_s5, 16 }
 0x258   :  { %p373_p5 = scmp.ne.s32.totalorder %s475_s5, %s372_s24  ;;  %p376_p6 = scmp.lt.u32.totalorder %s372_s24, %s475_s5 }
 0x25a   :  { %p378_p7 = pnand %p376_p6, %p373_p5 }
 0x25c   :  { %381 = shalt.err (!%p378_p7)
}
 0x25d   :  { %290 = dma.vmem_to_hbm [thread:$0]  %s288_s19, 16, %s475_s5, [#allocation3]  }
 0x25e   :  { %382 = dma.done.wait [#allocation3], 16  }
 0x25f   :  { %383 = vsyncadd [#allocation3], 4294967280 }
 0x260   :  { %298 = vsyncpa [#allocation3], 1 }

</bundles_post_ra>
